<compile_context>
chip_gen: v7x
topology: tpu7x:2x2x1
jax: 0.10.0
libtpu: 0.0.40
codegen_flags: <defaults>
</compile_context>

<pallas_src>
import functools
import math

import jax
import jax.numpy as jnp
from jax.experimental import pallas as pl
from jax.experimental.pallas import tpu as pltpu

LN_EPS = 1e-12  # espnet-style LayerNorm eps


def _clamp_vmem(nbytes):
    # Raise the default scoped-VMEM limit (16 MiB on v5e / 32 MiB on v6e,v7x) but stay
    # below v7x's 64 MiB physical VMEM.
    return int(min(max(nbytes, 32 << 20), 56 << 20))


# ----------------------------------------------------------------------------
# Pallas kernels
# ----------------------------------------------------------------------------
def _mm_bias_relu_kernel(x_ref, w_ref, b_ref, o_ref):
    o_ref[...] = jnp.maximum(
        jnp.dot(x_ref[...].astype(jnp.bfloat16), w_ref[...],
                preferred_element_type=jnp.float32) + b_ref[...],
        0.0)


def _embed_kernel(x_ref, w_ref, b_ref, pe_ref, o_ref, *, scale):
    # Linear(odim*F2 -> D) fused with x*sqrt(D) + positional encoding (dropout = identity).
    y = jnp.dot(x_ref[0].astype(jnp.bfloat16), w_ref[...],
                preferred_element_type=jnp.float32) + b_ref[...]
    o_ref[0] = y * scale + pe_ref[...]


def _layer_norm(v, g, b):
    mu = jnp.mean(v, axis=-1, keepdims=True)
    var = jnp.mean((v - mu) ** 2, axis=-1, keepdims=True)
    return (v - mu) * jax.lax.rsqrt(var + LN_EPS) * g + b


def _encoder_stack_kernel(x_ref, m_ref,
                          ln1g_ref, ln1b_ref,
                          wq_ref, bq_ref, wk_ref, bk_ref, wv_ref, bv_ref,
                          wo_ref, bo_ref,
                          ln2g_ref, ln2b_ref,
                          w1_ref, b1_ref, w2_ref, b2_ref,
                          afg_ref, afb_ref,
                          o_ref, x_scr, *, n_heads):
    """grid = (batch_tiles, layers).

    The (Bt, T, D) activation tile stays resident in VMEM scratch across the layer axis, so
    per-layer (bf16) weights are streamed from HBM once per batch tile; layer-(l+1) weights
    prefetch while layer l computes.
    """
    layer = pl.program_id(1)
    n_layers = pl.num_programs(1)
    Bt, T, D = x_ref.shape
    H = n_heads
    dk = D // H
    inv_sqrt_dk = 1.0 / math.sqrt(dk)
    neg = jnp.finfo(jnp.float32).min
    bf16 = jnp.bfloat16

    @pl.when(layer == 0)
    def _():
        x_scr[...] = x_ref[...]          # load the embedded batch tile once

    wq = wq_ref[0]
    wk = wk_ref[0]
    wv = wv_ref[0]
    wo = wo_ref[0]
    w1 = w1_ref[0]
    w2 = w2_ref[0]

    for b in range(Bt):                   # static unroll over the resident batch tile
        x = x_scr[b]                      # (T, D) f32
        mask_b = m_ref[b] > 0.5           # (1, T): True = valid key position

        # ---- pre-LN multi-head self-attention: full-width (D -> D) projections ----
        xn = _layer_norm(x, ln1g_ref[0], ln1b_ref[0]).astype(bf16)
        q = (jnp.dot(xn, wq, preferred_element_type=jnp.float32) + bq_ref[0]).astype(bf16)
        k = (jnp.dot(xn, wk, preferred_element_type=jnp.float32) + bk_ref[0]).astype(bf16)
        v = (jnp.dot(xn, wv, preferred_element_type=jnp.float32) + bv_ref[0]).astype(bf16)

        ctx_heads = []
        for h in range(H):               # head split via static lane slices
            qh = q[:, h * dk:(h + 1) * dk]
            kh = k[:, h * dk:(h + 1) * dk]
            vh = v[:, h * dk:(h + 1) * dk]
            s = jnp.einsum('qd,kd->qk', qh, kh,
                           preferred_element_type=jnp.float32) * inv_sqrt_dk
            s = jnp.where(mask_b, s, neg)                       # masked_fill(mask==0, min)
            e = jnp.exp(s - jnp.max(s, axis=-1, keepdims=True))
            p = e * pl.reciprocal(jnp.sum(e, axis=-1, keepdims=True), approx=True)
            p = jnp.where(mask_b, p, 0.0)                       # masked_fill(mask==0, 0.0)
            ctx_heads.append(jnp.dot(p.astype(bf16), vh,
                                     preferred_element_type=jnp.float32))
        ctx = jnp.concatenate(ctx_heads, axis=-1).astype(bf16)   # head concat -> (T, D)
        att = jnp.dot(ctx, wo, preferred_element_type=jnp.float32) + bo_ref[0]
        x = x + att                                               # residual (dropout = identity)

        # ---- pre-LN position-wise feed forward ----
        xn2 = _layer_norm(x, ln2g_ref[0], ln2b_ref[0]).astype(bf16)
        h1 = jnp.maximum(
            jnp.dot(xn2, w1, preferred_element_type=jnp.float32) + b1_ref[0],
            0.0).astype(bf16)
        x = x + jnp.dot(h1, w2, preferred_element_type=jnp.float32) + b2_ref[0]

        x_scr[b] = x

    @pl.when(layer == n_layers - 1)
    def _():
        # final LayerNorm (normalize_before=True) fused into the last layer step
        o_ref[...] = _layer_norm(x_scr[...], afg_ref[...], afb_ref[...])


# ----------------------------------------------------------------------------
# Pallas call wrappers
# ----------------------------------------------------------------------------
def pallas_matmul_bias_relu(x, w, b, tm=256):
    M, K = x.shape
    N = w.shape[1]
    tm = min(tm, M)
    est = 2 * (tm * K * 4 + K * N * 2 + N * 4 + tm * N * 4)
    return pl.pallas_call(
        _mm_bias_relu_kernel,
        grid=(pl.cdiv(M, tm),),
        out_shape=jax.ShapeDtypeStruct((M, N), jnp.float32),
        in_specs=[pl.BlockSpec((tm, K), lambda i: (i, 0)),
                  pl.BlockSpec((K, N), lambda i: (0, 0)),
                  pl.BlockSpec((1, N), lambda i: (0, 0))],
        out_specs=pl.BlockSpec((tm, N), lambda i: (i, 0)),
        compiler_params=pltpu.CompilerParams(
            dimension_semantics=("parallel",),
            vmem_limit_bytes=_clamp_vmem(est)),
    )(x, w, b)


def pallas_embed(flat, w, b, pe, scale):
    B, T, F = flat.shape
    D = w.shape[1]
    est = 2 * (T * F * 4 + F * D * 2 + D * 4 + 2 * T * D * 4)
    return pl.pallas_call(
        functools.partial(_embed_kernel, scale=scale),
        grid=(B,),
        out_shape=jax.ShapeDtypeStruct((B, T, D), jnp.float32),
        in_specs=[pl.BlockSpec((1, T, F), lambda i: (i, 0, 0)),
                  pl.BlockSpec((F, D), lambda i: (0, 0)),
                  pl.BlockSpec((1, D), lambda i: (0, 0)),
                  pl.BlockSpec((T, D), lambda i: (0, 0))],   # PE shared across batch
        out_specs=pl.BlockSpec((1, T, D), lambda i: (i, 0, 0)),
        compiler_params=pltpu.CompilerParams(
            dimension_semantics=("parallel",),
            vmem_limit_bytes=_clamp_vmem(est)),
    )(flat, w, b, pe)


def pallas_encoder_stack(x, mask_f, pp, n_heads, batch_tile=None):
    B, T, D = x.shape
    L, _, ff = pp['w1'].shape
    Bt = B if batch_tile is None else batch_tile
    assert B % Bt == 0, "batch must be divisible by batch_tile"
    nbt = B // Bt

    weight_names = ['ln1_g', 'ln1_b', 'wq', 'bq', 'wk', 'bk', 'wv', 'bv',
                    'wo', 'bo', 'ln2_g', 'ln2_b', 'w1', 'b1', 'w2', 'b2']
    weights = [pp[n] for n in weight_names]

    def wspec(a):
        return pl.BlockSpec((1,) + a.shape[1:], lambda bt, l: (l, 0, 0))

    in_specs = ([pl.BlockSpec((Bt, T, D), lambda bt, l: (bt, 0, 0)),
                 pl.BlockSpec((Bt, 1, T), lambda bt, l: (bt, 0, 0))]
                + [wspec(a) for a in weights]
                + [pl.BlockSpec((1, D), lambda bt, l: (0, 0)),
                   pl.BlockSpec((1, D), lambda bt, l: (0, 0))])

    # --- VMEM budget: double-buffered per-layer weights + resident activation tile
    #     + in/out activation blocks + softmax / FFN intermediates. ---
    wl_bytes = sum(int(a.size) * a.dtype.itemsize for a in weights) // L
    act_blk = Bt * T * D * 4
    inter = 4 * T * max(n_heads * T, ff, 4 * D)
    vmem = _clamp_vmem(2 * (2 * wl_bytes + 3 * act_blk + inter) + (8 << 20))

    flops = int(2 * B * L * T * (4 * D * D + 2 * D * ff + 2 * T * D))
    transcendentals = int(B * L * n_heads * T * T)
    bytes_accessed = int(nbt * L * wl_bytes + 2 * B * T * D * 4 + B * T * 4)
    cost = pl.CostEstimate(flops=flops, transcendentals=transcendentals,
                           bytes_accessed=bytes_accessed)

    return pl.pallas_call(
        functools.partial(_encoder_stack_kernel, n_heads=n_heads),
        grid=(nbt, L),
        out_shape=jax.ShapeDtypeStruct((B, T, D), jnp.float32),
        in_specs=in_specs,
        out_specs=pl.BlockSpec((Bt, T, D), lambda bt, l: (bt, 0, 0)),
        scratch_shapes=[pltpu.VMEM((Bt, T, D), jnp.float32)],
        compiler_params=pltpu.CompilerParams(
            dimension_semantics=("parallel", "arbitrary"),
            vmem_limit_bytes=vmem),
        cost_estimate=cost,
    )(x, mask_f, *weights, pp['after_g'], pp['after_b'])


# ----------------------------------------------------------------------------
# Glue (NHWC im2col, positional encoding, parameters)
# ----------------------------------------------------------------------------
def im2col_3x3_s2_nhwc(x):
    # x: (B, H, W, C); kernel 3x3, stride 2, no padding. Patch feature index = (ki*3+kj)*C + c.
    B, H, W, C = x.shape
    Ho = (H - 3) // 2 + 1
    Wo = (W - 3) // 2 + 1
    cols = []
    for i in range(3):
        for j in range(3):
            cols.append(x[:, i:i + 2 * Ho - 1:2, j:j + 2 * Wo - 1:2, :])
    return jnp.concatenate(cols, axis=-1), Ho, Wo            # (B, Ho, Wo, 9*C)
    # TODO(synk): fuse im2col into the conv kernel (pl.ds shifted loads) to avoid the 9x HBM blowup.


def positional_encoding(T, D):
    pos = jnp.arange(T, dtype=jnp.float32)[:, None]
    div = jnp.exp(jnp.arange(0, D, 2, dtype=jnp.float32) * -(math.log(10000.0) / D))
    pe = jnp.zeros((T, D), jnp.float32)
    pe = pe.at[:, 0::2].set(jnp.sin(pos * div))
    pe = pe.at[:, 1::2].set(jnp.cos(pos * div))
    return pe


def init_params(key, idim, D, n_heads, ff, n_blocks):
    """Parameters in PyTorch-native layouts (Conv2d OIHW; Linear stored as (in, out))."""
    odim = D
    f2 = ((idim - 1) // 2 - 1) // 2
    keys = jax.random.split(key, 6 + n_blocks)

    def nrm(k, shape, s=0.05):
        return s * jax.random.normal(k, shape, jnp.float32)

    p = {
        'conv1_w': nrm(keys[0], (odim, 1, 3, 3)), 'conv1_b': nrm(keys[1], (odim,)),
        'conv2_w': nrm(keys[2], (odim, odim, 3, 3)), 'conv2_b': nrm(keys[3], (odim,)),
        'proj_w': nrm(keys[4], (odim * f2, D)), 'proj_b': nrm(keys[5], (D,)),
        'after_g': jnp.ones((D,), jnp.float32), 'after_b': jnp.zeros((D,), jnp.float32),
        'layers': [],
    }
    for i in range(n_blocks):
        lk = jax.random.split(keys[6 + i], 12)
        p['layers'].append({
            'ln1_g': jnp.ones((D,), jnp.float32), 'ln1_b': jnp.zeros((D,), jnp.float32),
            'wq': nrm(lk[0], (D, D)), 'bq': nrm(lk[1], (D,)),
            'wk': nrm(lk[2], (D, D)), 'bk': nrm(lk[3], (D,)),
            'wv': nrm(lk[4], (D, D)), 'bv': nrm(lk[5], (D,)),
            'wo': nrm(lk[6], (D, D)), 'bo': nrm(lk[7], (D,)),
            'ln2_g': jnp.ones((D,), jnp.float32), 'ln2_b': jnp.zeros((D,), jnp.float32),
            'w1': nrm(lk[8], (D, ff)), 'b1': nrm(lk[9], (ff,)),
            'w2': nrm(lk[10], (ff, D)), 'b2': nrm(lk[11], (D,)),
        })
    return p


def pack_params(p, idim, D, n_heads):
    """One-time repack: stacked per-layer weights, matmul weights in bf16, full-width layouts."""
    odim = D
    f2 = ((idim - 1) // 2 - 1) // 2
    layers = p['layers']
    bf16 = jnp.bfloat16

    def stack(name, dtype=jnp.float32):
        return jnp.stack([ly[name] for ly in layers], axis=0).astype(dtype)

    packed = {
        # conv OIHW -> im2col weight rows ordered (ki*3+kj)*C + c (bf16)
        'conv1_wm': p['conv1_w'].transpose(2, 3, 1, 0).reshape(9 * 1, odim).astype(bf16),
        'conv1_b': p['conv1_b'][None, :],
        'conv2_wm': p['conv2_w'].transpose(2, 3, 1, 0).reshape(9 * odim, odim).astype(bf16),
        'conv2_b': p['conv2_b'][None, :],
        # PyTorch flatten index is c*F2 + f; our NHWC flatten is f*odim + c:
        # permute projection rows once instead of transposing the activation.
        'proj_w': p['proj_w'].reshape(odim, f2, D).transpose(1, 0, 2)
                            .reshape(f2 * odim, D).astype(bf16),
        'proj_b': p['proj_b'][None, :],
        'after_g': p['after_g'][None, :], 'after_b': p['after_b'][None, :],
        # per-layer stacks: LN params / biases in f32, matmul weights full-width bf16
        'ln1_g': stack('ln1_g')[:, None, :], 'ln1_b': stack('ln1_b')[:, None, :],
        'ln2_g': stack('ln2_g')[:, None, :], 'ln2_b': stack('ln2_b')[:, None, :],
        'wq': stack('wq', bf16), 'bq': stack('bq')[:, None, :],
        'wk': stack('wk', bf16), 'bk': stack('bk')[:, None, :],
        'wv': stack('wv', bf16), 'bv': stack('bv')[:, None, :],
        'wo': stack('wo', bf16), 'bo': stack('bo')[:, None, :],
        'w1': stack('w1', bf16), 'b1': stack('b1')[:, None, :],
        'w2': stack('w2', bf16), 'b2': stack('b2')[:, None, :],
    }
    return packed


def encoder_forward(xs, masks, pp, D, n_heads):
    """xs: (B, T, idim) float32, masks: (B, 1, T) bool -> ((B, T', D), (B, 1, T'))."""
    B, T, idim = xs.shape
    odim = D

    # --- Conv2dSubsampling, NHWC end-to-end (conv = im2col + Pallas matmul+bias+ReLU) ---
    x = xs[:, :, :, None]                                    # (B, T, idim, 1)
    p1, T1, F1 = im2col_3x3_s2_nhwc(x)                        # (B, T1, F1, 9)
    y1 = pallas_matmul_bias_relu(p1.reshape(B * T1 * F1, -1), pp['conv1_wm'], pp['conv1_b'])
    y1 = y1.reshape(B, T1, F1, odim)                          # stays NHWC (no transpose)

    p2, T2, F2 = im2col_3x3_s2_nhwc(y1)                       # (B, T2, F2, 9*odim)
    y2 = pallas_matmul_bias_relu(p2.reshape(B * T2 * F2, -1), pp['conv2_wm'], pp['conv2_b'])
    flat = y2.reshape(B, T2, F2 * odim)                       # f-major flatten (proj rows permuted)

    # --- Linear + x*sqrt(D) + PE (PE passed once, shared across batch) ---
    pe = positional_encoding(T2, D)
    xenc = pallas_embed(flat, pp['proj_w'], pp['proj_b'], pe, math.sqrt(D))

    # --- mask subsampling exactly like Conv2dSubsampling ---
    m = masks[:, :, :-2:2][:, :, :-2:2]                       # (B, 1, T2) bool
    m_f = m.astype(jnp.float32)

    # --- full encoder-layer stack + final LayerNorm in ONE Pallas kernel ---
    out = pallas_encoder_stack(xenc, m_f, pp, n_heads)
    return out, m


# TODO(synk): dropout layers are identity (inference); training-mode dropout not implemented.
# TODO(synk): for very long subsampled sequences, switch the attention inner loop to
#             key-block tiling with online softmax to bound the (T, T) working set.

if __name__ == "__main__":
    B, T, idim = 2, 32, 16
    D, n_heads, ff, n_blocks = 32, 4, 64, 2

    key = jax.random.PRNGKey(0)
    k_x, k_p = jax.random.split(key)
    xs = jax.random.normal(k_x, (B, T, idim), jnp.float32)
    lengths = jnp.array([32, 24])
    masks = jnp.arange(T)[None, None, :] < lengths[:, None, None]   # (B, 1, T) bool

    params = init_params(k_p, idim, D, n_heads, ff, n_blocks)
    packed = pack_params(params, idim, D, n_heads)

    ys, out_masks = encoder_forward(xs, masks, packed, D, n_heads)
    jax.block_until_ready(ys)
    jax.block_until_ready(out_masks)
    assert ys.shape == (B, 7, D) and out_masks.shape == (B, 1, 7)
    print("KERNEL_OK")
</pallas_src>

<mosaic_0001>
module attributes {stable_mosaic.version = 11 : i64} {
  func.func @_mm_bias_relu_kernel(%arg0: i32, %arg1: memref<210x9xf32, #tpu.memory_space<vmem>>, %arg2: memref<9x32xbf16, #tpu.memory_space<vmem>>, %arg3: memref<1x32xf32, #tpu.memory_space<vmem>>, %arg4: memref<210x32xf32, #tpu.memory_space<vmem>>) attributes {dimension_semantics = [#tpu.dimension_semantics<parallel>], iteration_bounds = array<i64: 1>, scalar_prefetch = 0 : i64, scratch_operands = 0 : i64, tpu.core_type = #tpu.core_type<tc>, window_params = [{transform_indices = @transform_0, window_bounds = array<i64: 210, 9>}, {pipeline_mode = #tpu.pipeline_mode<synchronous>, transform_indices = @transform_1, window_bounds = array<i64: 9, 32>}, {pipeline_mode = #tpu.pipeline_mode<synchronous>, transform_indices = @transform_2, window_bounds = array<i64: 1, 32>}, {transform_indices = @transform_3, window_bounds = array<i64: 210, 32>}]} {
    %c0 = arith.constant 0 : index
    %c0_0 = arith.constant 0 : index
    %0 = vector.load %arg1[%c0, %c0_0] : memref<210x9xf32, #tpu.memory_space<vmem>>, vector<210x9xf32>
    %1 = arith.truncf %0 : vector<210x9xf32> to vector<210x9xbf16>
    %c0_1 = arith.constant 0 : index
    %c0_2 = arith.constant 0 : index
    %2 = vector.load %arg2[%c0_1, %c0_2] : memref<9x32xbf16, #tpu.memory_space<vmem>>, vector<9x32xbf16>
    %cst = arith.constant dense<0.000000e+00> : vector<210x32xf32>
    %3 = tpu.matmul %1, %2, %cst {dimension_numbers = #tpu.dot_dimension_numbers<[1], [0], [0], [1], [0, 0, 1, 1], [], []>} : vector<210x9xbf16>, vector<9x32xbf16>, vector<210x32xf32> -> vector<210x32xf32>
    %c0_3 = arith.constant 0 : index
    %c0_4 = arith.constant 0 : index
    %4 = vector.load %arg3[%c0_3, %c0_4] : memref<1x32xf32, #tpu.memory_space<vmem>>, vector<1x32xf32>
    %5 = vector.broadcast %4 : vector<1x32xf32> to vector<210x32xf32>
    %6 = arith.addf %3, %5 : vector<210x32xf32>
    %cst_5 = arith.constant 0.000000e+00 : f32
    %7 = vector.broadcast %cst_5 : f32 to vector<210x32xf32>
    %8 = arith.maximumf %6, %7 : vector<210x32xf32>
    %c0_6 = arith.constant 0 : index
    %c0_7 = arith.constant 0 : index
    %9 = vector.load %arg4[%c0_6, %c0_7] : memref<210x32xf32, #tpu.memory_space<vmem>>, vector<210x32xf32>
    tpu.vector_store %arg4[%c0_6, %c0_7], %8 {strides = array<i32>} : memref<210x32xf32, #tpu.memory_space<vmem>>, vector<210x32xf32>,
    return
  }
  func.func @transform_0(%arg0: i32) -> (i32, i32) {
    %c0_i32 = arith.constant 0 : i32
    %c0_i32_0 = arith.constant 0 : i32
    return %arg0, %c0_i32 : i32, i32
  }
  func.func @transform_1(%arg0: i32) -> (i32, i32) {
    %c0_i32 = arith.constant 0 : i32
    %c0_i32_0 = arith.constant 0 : i32
    %c0_i32_1 = arith.constant 0 : i32
    return %c0_i32, %c0_i32_0 : i32, i32
  }
  func.func @transform_2(%arg0: i32) -> (i32, i32) {
    %c0_i32 = arith.constant 0 : i32
    %c0_i32_0 = arith.constant 0 : i32
    %c0_i32_1 = arith.constant 0 : i32
    return %c0_i32, %c0_i32_0 : i32, i32
  }
  func.func @transform_3(%arg0: i32) -> (i32, i32) {
    %c0_i32 = arith.constant 0 : i32
    %c0_i32_0 = arith.constant 0 : i32
    return %arg0, %c0_i32 : i32, i32
  }
}

</mosaic_0001>

<bundles_post_ra>
// kernel: tpu_custom_call.1
= control target key start
LH: loop header
LB: loop body
LE: loop exit
PB: predicated region body
PF: predicated region fallthrough
CT: control target
= control target key end

     0   :  { %vm113_vm0 = vcmask 1043456   ;;  %vm114_vm1 = vcmask 1044480   ;;  %v389_v1 = vmov 65535   ;;  %vm70_vm2 = vcmask 72704   ;;  %s647_s1 = inlined_call_operand.vmem [shape: bf16[9,32], index: 1, kind: input, shape index: {}]   ;;  %s648_s0 = inlined_call_operand.vmem [shape: f32[210,9], index: 0, kind: input, shape index: {}]   ;;  %s649_s2 = inlined_call_operand.vmem [shape: f32[1,32], index: 2, kind: input, shape index: {}]   ;;  %s650_s3 = inlined_call_operand.vmem [shape: f32[210,32], index: 3, kind: output, shape index: {}]  }
   0x1   :  { %v388_v0 = vld [vmem:[%s647_s1] sm:$0x1f]   ;;  %v115_v2 = vsel %vm113_vm0, 4294967295, %v389_v1  ;;  %v16_v4 = vld [vmem:[%s648_s0 + $0x8] sm:$0xff]  ;;  %v17_v5 = vld [vmem:[%s648_s0 + $0x10] sm:$0xff]  ;;  %vm291_vm3 = vcmask 261120  }
   0x2   :  { %v15_v3 = vld [vmem:[%s648_s0] sm:$0xff]  ;;  %v116_v6 = vsel %vm114_vm1, %v115_v2, 0  ;;  %v18_v8 = vld [vmem:[%s648_s0 + $0x18] sm:$0xff]  ;;  %v32_v10 = vld [vmem:[%s648_s0 + $0x88] sm:$0xff]  ;;  %vm318_vm4 = vcmask 254976  }
   0x3   :  { %v42_v7 = vpack.c.bf16 %v16_v4, %v15_v3  ;;  %v31_v9 = vld [vmem:[%s648_s0 + $0x80] sm:$0xff]  ;;  %v118_v11 = vand.u32 %v388_v0, %v116_v6  ;;  %v33_v13 = vld [vmem:[%s648_s0 + $0x90] sm:$0xff]  ;;  %v34_v14 = vld [vmem:[%s648_s0 + $0x98] sm:$0xff]  ;;  %v43_v17 = vpack.c.bf16 %v18_v8, %v17_v5 }
   0x4   :  { %v50_v12 = vpack.c.bf16 %v32_v10, %v31_v9  ;;  %v19_v15 = vld [vmem:[%s648_s0 + $0x20] sm:$0xff]  ;;  %v20_v16 = vld [vmem:[%s648_s0 + $0x28] sm:$0xff]  ;;  %v51_v18 = vpack.c.bf16 %v34_v14, %v33_v13  ;;  %v21_v23 = vld [vmem:[%s648_s0 + $0x30] sm:$0xff] }
   0x5   :  { %357 = vmatprep.mubr.msk.bf16.mxu0 %vm70_vm2, %v42_v7  ;;  %355 = vmatprep.subr.bf16.mxu0 %v118_v11  ;;  %v35_v19 = vld [vmem:[%s648_s0 + $0xa0] sm:$0xff]  ;;  %v36_v20 = vld [vmem:[%s648_s0 + $0xa8] sm:$0xff]  ;;  %v44_v21 = vpack.c.bf16 %v20_v16, %v19_v15  ;;  %v22_v24 = vld [vmem:[%s648_s0 + $0x38] sm:$0xff] }
   0x6   :  { %385 = vmatprep.subr.bf16.mxu1 %v118_v11  ;;  %356 = vmatpush3.bf16.msra.mxu0 %v118_v11  ;;  %v52_v22 = vpack.c.bf16 %v36_v20, %v35_v19  ;;  %v37_v25 = vld [vmem:[%s648_s0 + $0xb0] sm:$0xff]  ;;  %v38_v26 = vld [vmem:[%s648_s0 + $0xb8] sm:$0xff]  ;;  %v23_v27 = vld [vmem:[%s648_s0 + $0x40] sm:$0xff]  ;;  %v45_v31 = vpack.c.bf16 %v22_v24, %v21_v23 }
   0x7   :  { %386 = vmatpush3.bf16.msra.mxu1 %v118_v11  ;;  %373 = vmatprep.mubr.msk.bf16.mxu1 %vm70_vm2, %v50_v12  ;;  %v24_v28 = vld [vmem:[%s648_s0 + $0x48] sm:$0xff]  ;;  %v39_v29 = vld [vmem:[%s648_s0 + $0xc0] sm:$0xff]  ;;  %v53_v32 = vpack.c.bf16 %v38_v26, %v37_v25  ;;  %v25_v35 = vld [vmem:[%s648_s0 + $0x50] sm:$0xff] }
   0x8   :  { %v40_v30 = vld [vmem:[%s648_s0 + $0xc8] sm:$0xff]  ;;  %v46_v33 = vpack.c.bf16 %v24_v28, %v23_v27  ;;  %v26_v36 = vld [vmem:[%s648_s0 + $0x58] sm:$0xff]  ;;  %v41_v37 = vld [vmem:[%s648_s0 + $0xd0] sm:$0x3] }
   0x9   :  { %358 = vmatmul.mubr.msk.bf16.vlgmr.msra.gmra.mrb[0].mxu0 %vm70_vm2, %v43_v17  ;;  %v54_v34 = vpack.c.bf16 %v40_v30, %v39_v29  ;;  %v27_v38 = vld [vmem:[%s648_s0 + $0x60] sm:$0xff]  ;;  %v28_v39 = vld [vmem:[%s648_s0 + $0x68] sm:$0xff]  ;;  %v47_v40 = vpack.c.bf16 %v26_v36, %v25_v35  ;;  %v55_v41 = vpack.c.bf16 %v41_v37, %v41_v37  ;;  %v29_v43 = vld [vmem:[%s648_s0 + $0x70] sm:$0xff] }
   0xa   :  { %374 = vmatmul.mubr.msk.bf16.vlgmr.msra.gmra.mrb[0].mxu1 %vm70_vm2, %v51_v18  ;;  %361 = vmatprep.mubr.msk.bf16.mxu0 %vm70_vm2, %v44_v21  ;;  %v48_v42 = vpack.c.bf16 %v28_v39, %v27_v38  ;;  %v30_v44 = vld [vmem:[%s648_s0 + $0x78] sm:$0xff]  ;;  %v511_v46 = vld [vmem:[%s649_s2] ss:$0 sm:$0xff] }
   0xb   :  { %377 = vmatprep.mubr.msk.bf16.mxu1 %vm70_vm2, %v52_v22  ;;  %v49_v45 = vpack.c.bf16 %v30_v44, %v29_v43 }
  0x11   :  { %362 = vmatmul.mubr.msk.bf16.gmra.mrb[4].mxu0 %vm70_vm2, %v45_v31 }
  0x12   :  { %378 = vmatmul.mubr.msk.bf16.gmra.mrb[4].mxu1 %vm70_vm2, %v53_v32  ;;  %365 = vmatprep.mubr.msk.bf16.mxu0 %vm70_vm2, %v46_v33 }
  0x13   :  { %381 = vmatprep.mubr.msk.bf16.mxu1 %vm70_vm2, %v54_v34 }
  0x19   :  { %366 = vmatmul.mubr.msk.bf16.gmra.mrb[8].mxu0 %vm70_vm2, %v47_v40 }
  0x1a   :  { %382 = vmatmul.mubr.msk.bf16.gmra.mrb[8].mxu1 %vm70_vm2, %v55_v41  ;;  %369 = vmatprep.mubr.msk.bf16.mxu0 %vm70_vm2, %v48_v42 }
  0x21   :  { %370 = vmatmul.mubr.msk.bf16.gmra.mrb[12].mxu0 %vm70_vm2, %v49_v45 }
  0xdc   :  { %v359_v47 = vpop.f32.mrb[0].mxu0 }
  0xdd   :  { %v375_v48 = vpop.f32.mrb[0].mxu1  ;;  %v163_v49 = vadd.f32 %v359_v47, %v511_v46  ;;  %v154_v50 = vpop.f32.mrb[1].mxu0 }
  0xde   :  { %v227_v51 = vadd.f32 %v375_v48, %v511_v46  ;;  %v218_v52 = vpop.f32.mrb[1].mxu1  ;;  %v155_v53 = vadd.f32 %v511_v46, %v154_v50  ;;  %v360_v54 = vpop.f32.mrb[2].mxu0 }
  0xdf   :  { %v219_v55 = vadd.f32 %v511_v46, %v218_v52  ;;  %v376_v56 = vpop.f32.mrb[2].mxu1  ;;  %v266_v57 = vmax.f32 %v163_v49, 0.0  ;;  %v166_v58 = vadd.f32 %v360_v54, %v511_v46  ;;  %v157_v59 = vpop.f32.mrb[3].mxu0 }
  0xe0   :  { %v282_v60 = vmax.f32 %v227_v51, 0.0  ;;  %v230_v61 = vadd.f32 %v376_v56, %v511_v46  ;;  %v221_v62 = vpop.f32.mrb[3].mxu1  ;;  %v264_v63 = vmax.f32 %v155_v53, 0.0  ;;  %v158_v0 = vadd.f32 %v511_v46, %v157_v59 }
  0xe1   :  { %v280_v1 = vmax.f32 %v219_v55, 0.0  ;;  %v222_v2 = vadd.f32 %v511_v46, %v221_v62  ;;  %294 = vst.msk [vmem:[%s650_s3 + $0x10] sm:$0xff] %vm291_vm3, %v266_v57  ;;  %v267_v3 = vmax.f32 %v166_v58, 0.0 }
  0xe2   :  { %310 = vst.msk [vmem:[%s650_s3 + $0x90] sm:$0xff] %vm291_vm3, %v282_v60  ;;  %v283_v4 = vmax.f32 %v230_v61, 0.0  ;;  %292 = vst.msk [vmem:[%s650_s3] sm:$0xff] %vm291_vm3, %v264_v63  ;;  %v265_v5 = vmax.f32 %v158_v0, 0.0 }
  0xe3   :  { %308 = vst.msk [vmem:[%s650_s3 + $0x80] sm:$0xff] %vm291_vm3, %v280_v1  ;;  %v281_v6 = vmax.f32 %v222_v2, 0.0  ;;  %295 = vst.msk [vmem:[%s650_s3 + $0x18] sm:$0xff] %vm291_vm3, %v267_v3 }
  0xe4   :  { %311 = vst.msk [vmem:[%s650_s3 + $0x98] sm:$0xff] %vm291_vm3, %v283_v4  ;;  %293 = vst.msk [vmem:[%s650_s3 + $0x8] sm:$0xff] %vm291_vm3, %v265_v5  ;;  %v363_v7 = vpop.f32.mrb[4].mxu0 }
  0xe5   :  { %309 = vst.msk [vmem:[%s650_s3 + $0x88] sm:$0xff] %vm291_vm3, %v281_v6  ;;  %v379_v8 = vpop.f32.mrb[4].mxu1  ;;  %v179_v9 = vadd.f32 %v363_v7, %v511_v46  ;;  %v170_v10 = vpop.f32.mrb[5].mxu0 }
  0xe6   :  { %v243_v11 = vadd.f32 %v379_v8, %v511_v46  ;;  %v234_v12 = vpop.f32.mrb[5].mxu1  ;;  %v171_v13 = vadd.f32 %v511_v46, %v170_v10  ;;  %v364_v14 = vpop.f32.mrb[6].mxu0 }
  0xe7   :  { %v235_v15 = vadd.f32 %v511_v46, %v234_v12  ;;  %v380_v16 = vpop.f32.mrb[6].mxu1  ;;  %v270_v17 = vmax.f32 %v179_v9, 0.0  ;;  %v182_v18 = vadd.f32 %v364_v14, %v511_v46  ;;  %v173_v19 = vpop.f32.mrb[7].mxu0 }
  0xe8   :  { %v286_v20 = vmax.f32 %v243_v11, 0.0  ;;  %v246_v21 = vadd.f32 %v380_v16, %v511_v46  ;;  %v237_v22 = vpop.f32.mrb[7].mxu1  ;;  %v268_v23 = vmax.f32 %v171_v13, 0.0  ;;  %v174_v24 = vadd.f32 %v511_v46, %v173_v19 }
  0xe9   :  { %v284_v25 = vmax.f32 %v235_v15, 0.0  ;;  %v238_v26 = vadd.f32 %v511_v46, %v237_v22  ;;  %298 = vst.msk [vmem:[%s650_s3 + $0x30] sm:$0xff] %vm291_vm3, %v270_v17  ;;  %v271_v27 = vmax.f32 %v182_v18, 0.0 }
  0xea   :  { %314 = vst.msk [vmem:[%s650_s3 + $0xb0] sm:$0xff] %vm291_vm3, %v286_v20  ;;  %v287_v28 = vmax.f32 %v246_v21, 0.0  ;;  %296 = vst.msk [vmem:[%s650_s3 + $0x20] sm:$0xff] %vm291_vm3, %v268_v23  ;;  %v269_v29 = vmax.f32 %v174_v24, 0.0 }
  0xeb   :  { %312 = vst.msk [vmem:[%s650_s3 + $0xa0] sm:$0xff] %vm291_vm3, %v284_v25  ;;  %v285_v30 = vmax.f32 %v238_v26, 0.0  ;;  %299 = vst.msk [vmem:[%s650_s3 + $0x38] sm:$0xff] %vm291_vm3, %v271_v27 }
  0xec   :  { %315 = vst.msk [vmem:[%s650_s3 + $0xb8] sm:$0xff] %vm291_vm3, %v287_v28  ;;  %297 = vst.msk [vmem:[%s650_s3 + $0x28] sm:$0xff] %vm291_vm3, %v269_v29  ;;  %v367_v31 = vpop.f32.mrb[8].mxu0 }
  0xed   :  { %313 = vst.msk [vmem:[%s650_s3 + $0xa8] sm:$0xff] %vm291_vm3, %v285_v30  ;;  %v383_v32 = vpop.f32.mrb[8].mxu1  ;;  %v195_v33 = vadd.f32 %v367_v31, %v511_v46  ;;  %v186_v34 = vpop.f32.mrb[9].mxu0 }
  0xee   :  { %v259_v35 = vadd.f32 %v383_v32, %v511_v46  ;;  %v250_v36 = vpop.f32.mrb[9].mxu1  ;;  %v187_v37 = vadd.f32 %v511_v46, %v186_v34  ;;  %v368_v38 = vpop.f32.mrb[10].mxu0 }
  0xef   :  { %v251_v39 = vadd.f32 %v511_v46, %v250_v36  ;;  %v384_v40 = vpop.f32.mrb[10].mxu1  ;;  %v274_v41 = vmax.f32 %v195_v33, 0.0  ;;  %v198_v42 = vadd.f32 %v368_v38, %v511_v46  ;;  %v189_v43 = vpop.f32.mrb[11].mxu0 }
  0xf0   :  { %v290_v44 = vmax.f32 %v259_v35, 0.0  ;;  %v253_v45 = vpop.f32.mrb[11].mxu1  ;;  %v272_v47 = vmax.f32 %v187_v37, 0.0  ;;  %v190_v48 = vadd.f32 %v511_v46, %v189_v43 }
  0xf1   :  { %v288_v49 = vmax.f32 %v251_v39, 0.0  ;;  %v254_v50 = vadd.f32 %v511_v46, %v253_v45  ;;  %302 = vst.msk [vmem:[%s650_s3 + $0x50] sm:$0xff] %vm291_vm3, %v274_v41  ;;  %v275_v51 = vmax.f32 %v198_v42, 0.0 }
  0xf2   :  { %319 = vst.msk [vmem:[%s650_s3 + $0xd0] sm:$0x3] %vm318_vm4, %v290_v44  ;;  %v273_v52 = vmax.f32 %v190_v48, 0.0 }
  0xf3   :  { %300 = vst.msk [vmem:[%s650_s3 + $0x40] sm:$0xff] %vm291_vm3, %v272_v47  ;;  %316 = vst.msk [vmem:[%s650_s3 + $0xc0] sm:$0xff] %vm291_vm3, %v288_v49  ;;  %v289_v53 = vmax.f32 %v254_v50, 0.0 }
  0xf4   :  { %303 = vst.msk [vmem:[%s650_s3 + $0x58] sm:$0xff] %vm291_vm3, %v275_v51  ;;  %301 = vst.msk [vmem:[%s650_s3 + $0x48] sm:$0xff] %vm291_vm3, %v273_v52  ;;  %v371_v54 = vpop.f32.mrb[12].mxu0 }
  0xf5   :  { %317 = vst.msk [vmem:[%s650_s3 + $0xc8] sm:$0xff] %vm291_vm3, %v289_v53  ;;  %v211_v55 = vadd.f32 %v371_v54, %v511_v46  ;;  %v202_v56 = vpop.f32.mrb[13].mxu0 }
  0xf6   :  { %v203_v57 = vadd.f32 %v511_v46, %v202_v56  ;;  %v372_v58 = vpop.f32.mrb[14].mxu0 }
  0xf7   :  { %v278_v59 = vmax.f32 %v211_v55, 0.0  ;;  %v214_v60 = vadd.f32 %v372_v58, %v511_v46  ;;  %v205_v61 = vpop.f32.mrb[15].mxu0 }
  0xf8   :  { %v276_v62 = vmax.f32 %v203_v57, 0.0  ;;  %v206_v63 = vadd.f32 %v511_v46, %v205_v61 }
  0xf9   :  { %306 = vst.msk [vmem:[%s650_s3 + $0x70] sm:$0xff] %vm291_vm3, %v278_v59  ;;  %v279_v0 = vmax.f32 %v214_v60, 0.0 }
  0xfa   :  { %304 = vst.msk [vmem:[%s650_s3 + $0x60] sm:$0xff] %vm291_vm3, %v276_v62  ;;  %v277_v1 = vmax.f32 %v206_v63, 0.0 }
  0xfb   :  { %307 = vst.msk [vmem:[%s650_s3 + $0x78] sm:$0xff] %vm291_vm3, %v279_v0 }
  0xfc   :  { %305 = vst.msk [vmem:[%s650_s3 + $0x68] sm:$0xff] %vm291_vm3, %v277_v1 }

</bundles_post_ra>
